<compile_context>
chip_gen: v7x
topology: tpu7x:2x2x1
jax: 0.10.0
libtpu: 0.0.40
codegen_flags: <defaults>
</compile_context>

<pallas_src>
import functools

import jax
import jax.numpy as jnp
from jax.experimental import pallas as pl
from jax.experimental.pallas import tpu as pltpu


_VPU_MAX_C = 8                        # above this the VPU path is VALU-bound -> MXU
_SLAB_TARGET_BYTES = 4 * 1024 * 1024  # target size of one (C, tm) f32 tile


def _round_up(x, m):
    return (x + m - 1) // m * m


def _round_down(x, m):
    return x // m * m


def _cdiv(a, b):
    return (a + b - 1) // b


def _vmem_capacity_bytes():
    """Physical VMEM of the attached TPU; fallback = v7x's 64 MiB (smallest)."""
    try:
        return int(pltpu.get_tpu_info().vmem_capacity_bytes)
    except Exception:
        return 64 * 1024 * 1024


def _plan(C, HW, N, tm_cap, w_itemsize, vmem_cap):
    """Pick a lane-dense pixel tile (multiple of 128) and a scoped-VMEM limit."""
    c_pad = _round_up(C, 8)                       # sublane padding
    hw_cap = max(128, _round_up(HW, 128))

    # Per-generation scoped-VMEM limit (~3/4 of physical, capped at 100 MiB);
    # the tile plan targets ~3/4 of that to leave headroom for Mosaic scratch.
    vmem_limit = int(min(vmem_cap * 3 // 4, 100 * 1024 * 1024))
    budget = vmem_limit * 3 // 4

    # tm from a per-slab byte target so small C still gets wide tiles.
    tm = max(128, _round_down(_SLAB_TARGET_BYTES // (c_pad * 4), 128))
    tm = min(tm, hw_cap)
    if tm_cap is not None:
        tm = min(tm, max(128, _round_up(tm_cap, 128)))

    def vmem_est(t):
        tiles = 2 * 2 * c_pad * t * 4             # x + out tiles, double-buffered
        temps = 3 * c_pad * t * 4                 # h / casts / y (MXU worst case)
        wts = 2 * 2 * (c_pad * _round_up(C, 128) * w_itemsize   # W1/W2 (dbl-buffered)
                       + c_pad * 128 * 4)                       # b1/b2
        return tiles + temps + wts

    while tm > 128 and vmem_est(tm) > budget:
        tm = max(128, _round_down(tm // 2, 128))

    # >= 2 grid steps: pipelining overlap, and both TensorCores on v7x.
    while tm > 128 and N * _cdiv(HW, tm) < 2:
        tm = max(128, _round_down(tm // 2, 128))

    return tm, vmem_limit


def _vpu_kernel(x_ref, w1_ref, b1_ref, w2_ref, b2_ref, o_ref):
    """Small-C path (C <= 8): unrolled VPU broadcast-FMAs on (C, tm) tiles.

    x_ref/o_ref: (C, tm); w*_ref: (C, C) f32; b*_ref: (C, 1) f32.
    The kernel is HBM-bound at this size; broadcasts hide under the DMAs.
    """
    x = x_ref[...]
    c = x.shape[0]
    w1 = w1_ref[...]
    w2 = w2_ref[...]

    # layer 1: h = relu(W1 @ x + b1) as C broadcast-FMAs on full (C, tm) tiles
    acc = jnp.broadcast_to(b1_ref[...], x.shape)
    for i in range(c):
        acc = acc + w1[:, i:i + 1] * x[i:i + 1, :]
    h = jnp.maximum(acc, 0.0)

    # layer 2: y = relu(W2 @ h + b2)
    acc = jnp.broadcast_to(b2_ref[...], x.shape)
    for i in range(c):
        acc = acc + w2[:, i:i + 1] * h[i:i + 1, :]
    y = jnp.maximum(acc, 0.0)

    o_ref[...] = (y + x).astype(o_ref.dtype)      # residual add in f32


def _mxu_kernel(x_ref, w1_ref, b1_ref, w2_ref, b2_ref, o_ref):
    """Large-C path: MXU matmuls with f32 accumulation.

    x_ref/o_ref: (C, tm) f32; w*_ref: (C, C) f32 (bf16 if bf16_matmul);
    b*_ref: (C, 1) f32.
    """
    x = x_ref[...]
    w1 = w1_ref[...]
    w2 = w2_ref[...]
    h = jnp.dot(w1, x.astype(w1.dtype), preferred_element_type=jnp.float32)
    h = jnp.maximum(h + b1_ref[...], 0.0)
    y = jnp.dot(w2, h.astype(w2.dtype), preferred_element_type=jnp.float32)
    y = jnp.maximum(y + b2_ref[...], 0.0)
    o_ref[...] = (y + x).astype(o_ref.dtype)      # residual add in f32


@functools.partial(jax.jit, static_argnames=("tm", "out_dtype", "bf16_matmul"))
def spectral_res_block_pallas(x_nchw, w1, b1, w2, b2, *, tm=None,
                              out_dtype=None, bf16_matmul=False):
    """y = ReLU(W2 @ ReLU(W1 @ x + b1) + b2) + x per pixel (1x1 convs).

    x_nchw: (N, C, H, W) f32.  w1, w2: (C, C) 1x1-conv weights.  b1, b2: (C,).
    `tm` optionally caps the pixel-tile width; `out_dtype`/`bf16_matmul` trade
    precision for HBM traffic / MXU throughput when the caller allows it.
    """
    N, C, H, W = x_nchw.shape
    HW = H * W
    x3 = x_nchw.reshape(N, C, HW)                 # free view, no transpose

    use_mxu = C > _VPU_MAX_C
    kernel = _mxu_kernel if use_mxu else _vpu_kernel
    w_dtype = jnp.bfloat16 if (use_mxu and bf16_matmul) else jnp.float32
    o_dtype = jnp.dtype(out_dtype) if out_dtype is not None else x3.dtype

    vmem_cap = _vmem_capacity_bytes()
    tm_eff, vmem_limit = _plan(C, HW, N, tm, jnp.dtype(w_dtype).itemsize, vmem_cap)

    w1_k = w1.astype(w_dtype)
    w2_k = w2.astype(w_dtype)
    b1_k = b1.reshape(C, 1).astype(jnp.float32)
    b2_k = b2.reshape(C, 1).astype(jnp.float32)

    grid = (N, _cdiv(HW, tm_eff))                 # ragged tail handled by clipping

    out3 = pl.pallas_call(
        kernel,
        out_shape=jax.ShapeDtypeStruct((N, C, HW), o_dtype),
        grid_spec=pltpu.PrefetchScalarGridSpec(
            num_scalar_prefetch=0,
            grid=grid,
            in_specs=[
                pl.BlockSpec((None, C, tm_eff), lambda n, j: (n, 0, j)),  # x tile
                pl.BlockSpec((C, C), lambda n, j: (0, 0)),                # W1
                pl.BlockSpec((C, 1), lambda n, j: (0, 0)),                # b1
                pl.BlockSpec((C, C), lambda n, j: (0, 0)),                # W2
                pl.BlockSpec((C, 1), lambda n, j: (0, 0)),                # b2
            ],
            out_specs=pl.BlockSpec((None, C, tm_eff), lambda n, j: (n, 0, j)),
        ),
        compiler_params=pltpu.CompilerParams(
            dimension_semantics=("parallel", "parallel"),
            vmem_limit_bytes=vmem_limit,
        ),
    )(x3, w1_k, b1_k, w2_k, b2_k)

    return out3.reshape(N, C, H, W)


def _reference(x, w1, b1, w2, b2):
    # Pure-JAX reference of the PyTorch forward (1x1 convs == channel matmuls).
    h = jnp.einsum("nchw,oc->nohw", x, w1) + b1[None, :, None, None]
    h = jnp.maximum(h, 0.0)
    y = jnp.einsum("nchw,oc->nohw", h, w2) + b2[None, :, None, None]
    return jnp.maximum(y, 0.0) + x


if __name__ == "__main__":
    keys = jax.random.split(jax.random.PRNGKey(0), 10)

    # --- config matching the PyTorch demo (small C -> VPU path) -------------
    N, C, H, W = 2, 4, 16, 16
    x = jax.random.normal(keys[0], (N, C, H, W), dtype=jnp.float32)
    s = 1.0 / jnp.sqrt(jnp.float32(C))
    w1 = jax.random.uniform(keys[1], (C, C), minval=-s, maxval=s, dtype=jnp.float32)
    b1 = jax.random.uniform(keys[2], (C,), minval=-s, maxval=s, dtype=jnp.float32)
    w2 = jax.random.uniform(keys[3], (C, C), minval=-s, maxval=s, dtype=jnp.float32)
    b2 = jax.random.uniform(keys[4], (C,), minval=-s, maxval=s, dtype=jnp.float32)

    out = jax.block_until_ready(spectral_res_block_pallas(x, w1, b1, w2, b2))
    ref = _reference(x, w1, b1, w2, b2)
    assert out.shape == (N, C, H, W)
    assert jnp.allclose(out, ref, atol=1e-5, rtol=1e-5), \
        float(jnp.max(jnp.abs(out - ref)))

    # --- larger-C config: MXU path + ragged pixel tail (576 = 2*256 + 64) ---
    N2, C2, H2, W2 = 2, 128, 24, 24
    x2 = jax.random.normal(keys[5], (N2, C2, H2, W2), dtype=jnp.float32)
    s2 = 1.0 / jnp.sqrt(jnp.float32(C2))
    w1b = jax.random.uniform(keys[6], (C2, C2), minval=-s2, maxval=s2, dtype=jnp.float32)
    b1b = jax.random.uniform(keys[7], (C2,), minval=-s2, maxval=s2, dtype=jnp.float32)
    w2b = jax.random.uniform(keys[8], (C2, C2), minval=-s2, maxval=s2, dtype=jnp.float32)
    b2b = jax.random.uniform(keys[9], (C2,), minval=-s2, maxval=s2, dtype=jnp.float32)

    out2 = jax.block_until_ready(
        spectral_res_block_pallas(x2, w1b, b1b, w2b, b2b, tm=256))
    ref2 = _reference(x2, w1b, b1b, w2b, b2b)
    # MXU default matmul precision may round operands -> looser tolerance here.
    assert out2.shape == (N2, C2, H2, W2)
    assert jnp.allclose(out2, ref2, atol=5e-2, rtol=5e-2), \
        float(jnp.max(jnp.abs(out2 - ref2)))

    print("KERNEL_OK")
</pallas_src>

<mosaic_0001>
module attributes {stable_mosaic.version = 11 : i64} {
  func.func @_vpu_kernel(%arg0: i32, %arg1: i32, %arg2: memref<1x4x256xf32, #tpu.memory_space<vmem>>, %arg3: memref<4x4xf32, #tpu.memory_space<vmem>>, %arg4: memref<4x1xf32, #tpu.memory_space<vmem>>, %arg5: memref<4x4xf32, #tpu.memory_space<vmem>>, %arg6: memref<4x1xf32, #tpu.memory_space<vmem>>, %arg7: memref<1x4x256xf32, #tpu.memory_space<vmem>>) attributes {dimension_semantics = [#tpu.dimension_semantics<parallel>, #tpu.dimension_semantics<parallel>], iteration_bounds = array<i64: 2, 1>, scalar_prefetch = 0 : i64, scratch_operands = 0 : i64, tpu.core_type = #tpu.core_type<tc>, window_params = [{transform_indices = @transform_0, window_bounds = array<i64: 1, 4, 256>}, {pipeline_mode = #tpu.pipeline_mode<synchronous>, transform_indices = @transform_1, window_bounds = array<i64: 4, 4>}, {pipeline_mode = #tpu.pipeline_mode<synchronous>, transform_indices = @transform_2, window_bounds = array<i64: 4, 1>}, {pipeline_mode = #tpu.pipeline_mode<synchronous>, transform_indices = @transform_3, window_bounds = array<i64: 4, 4>}, {pipeline_mode = #tpu.pipeline_mode<synchronous>, transform_indices = @transform_4, window_bounds = array<i64: 4, 1>}, {transform_indices = @transform_5, window_bounds = array<i64: 1, 4, 256>}]} {
    %c0 = arith.constant 0 : index
    %c0_0 = arith.constant 0 : index
    %c0_1 = arith.constant 0 : index
    %0 = vector.load %arg2[%c0, %c0_0, %c0_1] : memref<1x4x256xf32, #tpu.memory_space<vmem>>, vector<1x4x256xf32>
    %1 = vector.shape_cast %0 : vector<1x4x256xf32> to vector<4x256xf32>
    %c0_2 = arith.constant 0 : index
    %c0_3 = arith.constant 0 : index
    %2 = vector.load %arg3[%c0_2, %c0_3] : memref<4x4xf32, #tpu.memory_space<vmem>>, vector<4x4xf32>
    %c0_4 = arith.constant 0 : index
    %c0_5 = arith.constant 0 : index
    %3 = vector.load %arg5[%c0_4, %c0_5] : memref<4x4xf32, #tpu.memory_space<vmem>>, vector<4x4xf32>
    %c0_6 = arith.constant 0 : index
    %c0_7 = arith.constant 0 : index
    %4 = vector.load %arg4[%c0_6, %c0_7] : memref<4x1xf32, #tpu.memory_space<vmem>>, vector<4x1xf32>
    %5 = vector.shape_cast %4 : vector<4x1xf32> to vector<4x1xf32>
    %6 = vector.broadcast %5 : vector<4x1xf32> to vector<4x256xf32>
    %7 = vector.extract_strided_slice %2 {offsets = [0, 0], sizes = [4, 1], strides = [1, 1]} : vector<4x4xf32> to vector<4x1xf32>
    %8 = vector.extract_strided_slice %1 {offsets = [0, 0], sizes = [1, 256], strides = [1, 1]} : vector<4x256xf32> to vector<1x256xf32>
    %9 = vector.broadcast %7 : vector<4x1xf32> to vector<4x256xf32>
    %10 = vector.broadcast %8 : vector<1x256xf32> to vector<4x256xf32>
    %11 = arith.mulf %9, %10 : vector<4x256xf32>
    %12 = arith.addf %6, %11 : vector<4x256xf32>
    %13 = vector.extract_strided_slice %2 {offsets = [0, 1], sizes = [4, 1], strides = [1, 1]} : vector<4x4xf32> to vector<4x1xf32>
    %14 = vector.extract_strided_slice %1 {offsets = [1, 0], sizes = [1, 256], strides = [1, 1]} : vector<4x256xf32> to vector<1x256xf32>
    %15 = vector.broadcast %13 : vector<4x1xf32> to vector<4x256xf32>
    %16 = vector.broadcast %14 : vector<1x256xf32> to vector<4x256xf32>
    %17 = arith.mulf %15, %16 : vector<4x256xf32>
    %18 = arith.addf %12, %17 : vector<4x256xf32>
    %19 = vector.extract_strided_slice %2 {offsets = [0, 2], sizes = [4, 1], strides = [1, 1]} : vector<4x4xf32> to vector<4x1xf32>
    %20 = vector.extract_strided_slice %1 {offsets = [2, 0], sizes = [1, 256], strides = [1, 1]} : vector<4x256xf32> to vector<1x256xf32>
    %21 = vector.broadcast %19 : vector<4x1xf32> to vector<4x256xf32>
    %22 = vector.broadcast %20 : vector<1x256xf32> to vector<4x256xf32>
    %23 = arith.mulf %21, %22 : vector<4x256xf32>
    %24 = arith.addf %18, %23 : vector<4x256xf32>
    %25 = vector.extract_strided_slice %2 {offsets = [0, 3], sizes = [4, 1], strides = [1, 1]} : vector<4x4xf32> to vector<4x1xf32>
    %26 = vector.extract_strided_slice %1 {offsets = [3, 0], sizes = [1, 256], strides = [1, 1]} : vector<4x256xf32> to vector<1x256xf32>
    %27 = vector.broadcast %25 : vector<4x1xf32> to vector<4x256xf32>
    %28 = vector.broadcast %26 : vector<1x256xf32> to vector<4x256xf32>
    %29 = arith.mulf %27, %28 : vector<4x256xf32>
    %30 = arith.addf %24, %29 : vector<4x256xf32>
    %cst = arith.constant 0.000000e+00 : f32
    %31 = vector.broadcast %cst : f32 to vector<4x256xf32>
    %32 = arith.maximumf %30, %31 : vector<4x256xf32>
    %c0_8 = arith.constant 0 : index
    %c0_9 = arith.constant 0 : index
    %33 = vector.load %arg6[%c0_8, %c0_9] : memref<4x1xf32, #tpu.memory_space<vmem>>, vector<4x1xf32>
    %34 = vector.shape_cast %33 : vector<4x1xf32> to vector<4x1xf32>
    %35 = vector.broadcast %34 : vector<4x1xf32> to vector<4x256xf32>
    %36 = vector.extract_strided_slice %3 {offsets = [0, 0], sizes = [4, 1], strides = [1, 1]} : vector<4x4xf32> to vector<4x1xf32>
    %37 = vector.extract_strided_slice %32 {offsets = [0, 0], sizes = [1, 256], strides = [1, 1]} : vector<4x256xf32> to vector<1x256xf32>
    %38 = vector.broadcast %36 : vector<4x1xf32> to vector<4x256xf32>
    %39 = vector.broadcast %37 : vector<1x256xf32> to vector<4x256xf32>
    %40 = arith.mulf %38, %39 : vector<4x256xf32>
    %41 = arith.addf %35, %40 : vector<4x256xf32>
    %42 = vector.extract_strided_slice %3 {offsets = [0, 1], sizes = [4, 1], strides = [1, 1]} : vector<4x4xf32> to vector<4x1xf32>
    %43 = vector.extract_strided_slice %32 {offsets = [1, 0], sizes = [1, 256], strides = [1, 1]} : vector<4x256xf32> to vector<1x256xf32>
    %44 = vector.broadcast %42 : vector<4x1xf32> to vector<4x256xf32>
    %45 = vector.broadcast %43 : vector<1x256xf32> to vector<4x256xf32>
    %46 = arith.mulf %44, %45 : vector<4x256xf32>
    %47 = arith.addf %41, %46 : vector<4x256xf32>
    %48 = vector.extract_strided_slice %3 {offsets = [0, 2], sizes = [4, 1], strides = [1, 1]} : vector<4x4xf32> to vector<4x1xf32>
    %49 = vector.extract_strided_slice %32 {offsets = [2, 0], sizes = [1, 256], strides = [1, 1]} : vector<4x256xf32> to vector<1x256xf32>
    %50 = vector.broadcast %48 : vector<4x1xf32> to vector<4x256xf32>
    %51 = vector.broadcast %49 : vector<1x256xf32> to vector<4x256xf32>
    %52 = arith.mulf %50, %51 : vector<4x256xf32>
    %53 = arith.addf %47, %52 : vector<4x256xf32>
    %54 = vector.extract_strided_slice %3 {offsets = [0, 3], sizes = [4, 1], strides = [1, 1]} : vector<4x4xf32> to vector<4x1xf32>
    %55 = vector.extract_strided_slice %32 {offsets = [3, 0], sizes = [1, 256], strides = [1, 1]} : vector<4x256xf32> to vector<1x256xf32>
    %56 = vector.broadcast %54 : vector<4x1xf32> to vector<4x256xf32>
    %57 = vector.broadcast %55 : vector<1x256xf32> to vector<4x256xf32>
    %58 = arith.mulf %56, %57 : vector<4x256xf32>
    %59 = arith.addf %53, %58 : vector<4x256xf32>
    %cst_10 = arith.constant 0.000000e+00 : f32
    %60 = vector.broadcast %cst_10 : f32 to vector<4x256xf32>
    %61 = arith.maximumf %59, %60 : vector<4x256xf32>
    %62 = arith.addf %61, %1 : vector<4x256xf32>
    %c0_11 = arith.constant 0 : index
    %c0_12 = arith.constant 0 : index
    %c0_13 = arith.constant 0 : index
    %63 = vector.load %arg7[%c0_11, %c0_12, %c0_13] : memref<1x4x256xf32, #tpu.memory_space<vmem>>, vector<1x4x256xf32>
    %64 = vector.shape_cast %63 : vector<1x4x256xf32> to vector<4x256xf32>
    %65 = vector.shape_cast %62 : vector<4x256xf32> to vector<1x4x256xf32>
    tpu.vector_store %arg7[%c0_11, %c0_12, %c0_13], %65 {strides = array<i32>} : memref<1x4x256xf32, #tpu.memory_space<vmem>>, vector<1x4x256xf32>,
    return
  }
  func.func @transform_0(%arg0: i32, %arg1: i32) -> (i32, i32, i32) {
    %c0_i32 = arith.constant 0 : i32
    %c0_i32_0 = arith.constant 0 : i32
    return %arg0, %c0_i32, %arg1 : i32, i32, i32
  }
  func.func @transform_1(%arg0: i32, %arg1: i32) -> (i32, i32) {
    %c0_i32 = arith.constant 0 : i32
    %c0_i32_0 = arith.constant 0 : i32
    %c0_i32_1 = arith.constant 0 : i32
    return %c0_i32, %c0_i32_0 : i32, i32
  }
  func.func @transform_2(%arg0: i32, %arg1: i32) -> (i32, i32) {
    %c0_i32 = arith.constant 0 : i32
    %c0_i32_0 = arith.constant 0 : i32
    %c0_i32_1 = arith.constant 0 : i32
    return %c0_i32, %c0_i32_0 : i32, i32
  }
  func.func @transform_3(%arg0: i32, %arg1: i32) -> (i32, i32) {
    %c0_i32 = arith.constant 0 : i32
    %c0_i32_0 = arith.constant 0 : i32
    %c0_i32_1 = arith.constant 0 : i32
    return %c0_i32, %c0_i32_0 : i32, i32
  }
  func.func @transform_4(%arg0: i32, %arg1: i32) -> (i32, i32) {
    %c0_i32 = arith.constant 0 : i32
    %c0_i32_0 = arith.constant 0 : i32
    %c0_i32_1 = arith.constant 0 : i32
    return %c0_i32, %c0_i32_0 : i32, i32
  }
  func.func @transform_5(%arg0: i32, %arg1: i32) -> (i32, i32, i32) {
    %c0_i32 = arith.constant 0 : i32
    %c0_i32_0 = arith.constant 0 : i32
    return %arg0, %c0_i32, %arg1 : i32, i32, i32
  }
}

</mosaic_0001>

<bundles_post_ra>
// kernel: spectral_res_block_pallas.1
= control target key start
LH: loop header
LB: loop body
LE: loop exit
PB: predicated region body
PF: predicated region fallthrough
CT: control target
= control target key end

     0   :  { %s659_s18 = smov 0   ;;  %s661_s19 = smov 0   ;;  %s728_s0 = inlined_call_operand.vmem [shape: f32[2,4,256], index: 0, kind: input, shape index: {}]   ;;  %s729_s1 = inlined_call_operand.vmem [shape: f32[4,4], index: 1, kind: input, shape index: {}]   ;;  %s730_s2 = inlined_call_operand.vmem [shape: f32[4,1], index: 2, kind: input, shape index: {}]   ;;  %s731_s3 = inlined_call_operand.vmem [shape: f32[4,4], index: 3, kind: input, shape index: {}]   ;;  %s732_s4 = inlined_call_operand.vmem [shape: f32[4,1], index: 4, kind: input, shape index: {}]   ;;  %s733_s5 = inlined_call_operand.vmem [shape: f32[2,4,256], index: 5, kind: output, shape index: {}]  }
   0x1   :  { %s663_s20 = smov 0  }
   0x2 LB: > { %s27_s21 = sadd.s32 1, %s619_s19  ;;  %p554_p0 = scmp.ge.s32.totalorder %s623_s20, 1  ;;  %s623_s20 = sphi %s663_s20, %s15_s20   ;;  %s619_s19 = sphi %s661_s19, %s735_s19   ;;  %s615_s18 = sphi %s659_s18, %s734_s18  }
   0x3   : > { %p29_p1 = scmp.ge.s32.totalorder %s27_s21, 2  ;;  %p208_p2 = scmp.lt.s32.totalorder %s623_s20, 3 }
   0x5   : > { %s737_s21 = smov (%p29_p1, %s27_s21), 0  ;;  %p209_p3 = pnand %p554_p0, %p208_p2 }
   0x6   : > { %v265_v0 = vld [vmem:[%s729_s1] sm:$0xf] (!%p209_p3)  ;;  %v625_v1 = vmov (!%p209_p3), 1   ;;  %v626_v2 = vmov (!%p209_p3), 0   ;;  %v627_v4 = vmov (!%p209_p3), 2   ;;  %v628_v6 = vmov (!%p209_p3), 3  }
   0x7   : > { %212 = sbr.rel (%p209_p3) target bundleno = 171 (0xab), region = 40  ;;  %592 = vset.pattern.permute.xlu1 (!%p209_p3), %v625_v1  ;;  %591 = vset.pattern.permute.xlu0 (!%p209_p3), %v626_v2  ;;  %v267_v3 = vld [vmem:[%s730_s2] sm:$0xf] (!%p209_p3)  ;;  %p245_p4 = scmp.lt.s32.totalorder (!%p209_p3), %s615_s18, 1  ;;  %v279_v8 = vlaneseq (!%p209_p3) }
   0x8   : > { %302 = vperm.xlu1 (!%p209_p3), %592, %v265_v0   ;;  %275 = vperm.xlu0 (!%p209_p3), %591, %v265_v0   ;;  %v266_v5 = vld [vmem:[%s731_s3] sm:$0xf] (!%p209_p3) }
   0x9   : > { %v381_v7 = vld [vmem:[%s732_s4] sm:$0xf] (!%p209_p3)  ;;  %v280_v9 = vshrl.u32 (!%p209_p3), %v279_v8, 7 }
   0xb   : > { %v281_v10 = vsub.s32 (!%p209_p3), 0, %v280_v9  ;;  %v285_v11 = vsub.s32 (!%p209_p3), 4, %v280_v9  ;;  %v307_v13 = vsub.s32 (!%p209_p3), 1, %v280_v9  ;;  %v311_v14 = vsub.s32 (!%p209_p3), 5, %v280_v9 }
   0xc   : > { %593 = vset.pattern.permute.xlu1 (!%p209_p3), %v627_v4  ;;  %270 = vperm.xlu0 (!%p209_p3), %591, %v267_v3   ;;  %v333_v17 = vsub.s32 (!%p209_p3), 2, %v280_v9  ;;  %v337_v18 = vsub.s32 (!%p209_p3), 6, %v280_v9  ;;  %v359_v25 = vsub.s32 (!%p209_p3), 3, %v280_v9  ;;  %v363_v26 = vsub.s32 (!%p209_p3), 7, %v280_v9 }
   0xd   : > { %328 = vperm.xlu1 (!%p209_p3), %593, %v265_v0  }
   0xe   : > { %s739_s18 = smov (!%p245_p4, %s615_s18), 1 }
   0xf   : > { %s561_s30 = sshll.u32 %s739_s18, 3 }
  0x10   : > { %594 = vset.pattern.permute.xlu0 %v628_v6  ;;  %s252_s8 = scalar_lea.vmem %s728_s0, %s561_s30  ;;  %s262_s11 = scalar_lea.vmem %s733_s5, %s561_s30 }
  0x11   : > { %595 = vset.pattern.permute.xlu1 %v626_v2  ;;  %354 = vperm.xlu0 %594, %v265_v0   ;;  %v701_v12 = vld [vmem:[%s252_s8] sm:$0xff] }
  0x12   : > { %389 = vperm.xlu1 %595, %v266_v5   ;;  %v282_v15 = vrot.slane %v701_v12, %v281_v10  ;;  %v286_v16 = vrot.slane %v701_v12, %v285_v11  ;;  %v308_v19 = vrot.slane %v701_v12, %v307_v13  ;;  %v312_v20 = vrot.slane %v701_v12, %v311_v14 }
  0x13   : > { %v334_v23 = vrot.slane %v701_v12, %v333_v17  ;;  %v338_v24 = vrot.slane %v701_v12, %v337_v18  ;;  %v360_v35 = vrot.slane %v701_v12, %v359_v25  ;;  %v364_v36 = vrot.slane %v701_v12, %v363_v26 }
  0x14   : > { %v292_v21 = vrot.slane %v282_v15, %v281_v10  ;;  %v296_v22 = vrot.slane %v286_v16, %v281_v10  ;;  %v318_v29 = vrot.slane %v308_v19, %v307_v13  ;;  %v322_v30 = vrot.slane %v312_v20, %v307_v13 }
  0x15   : > { %596 = vset.pattern.permute.xlu0 %v625_v1  ;;  %v344_v33 = vrot.slane %v334_v23, %v333_v17  ;;  %v348_v34 = vrot.slane %v338_v24, %v333_v17  ;;  %v370_v45 = vrot.slane %v360_v35, %v359_v25  ;;  %v374_v46 = vrot.slane %v364_v36, %v359_v25 }
  0x16   : > { %384 = vperm.xlu1 %595, %v381_v7   ;;  %405 = vperm.xlu0 %596, %v266_v5  }
  0x1a   : > { %597 = vset.pattern.permute.xlu1 %v627_v4  ;;  %599 = vset.pattern.permute.xlu0 %v628_v6 }
  0x1b   : > { %421 = vperm.xlu1 %597, %v266_v5  }
  0x1f   : > { %598 = vset.pattern.permute.xlu1 %v628_v6 }
  0x20   : > { %437 = vperm.xlu1 %598, %v266_v5  }
  0x87   : > { %v303_v27 = vpop.permute.xlu1 %302  ;;  %v276_v28 = vpop.permute.xlu0 %275 }
  0x88   : > { %v297_v31 = vmul.f32 %v292_v21, %v276_v28  ;;  %v298_v32 = vmul.f32 %v296_v22, %v276_v28  ;;  %v323_v38 = vmul.f32 %v318_v29, %v303_v27  ;;  %v324_v39 = vmul.f32 %v322_v30, %v303_v27 }
  0x8b   : > { %v271_v37 = vpop.permute.xlu0 %270 }
  0x8c   : > { %v299_v40 = vadd.f32 %v297_v31, %v271_v37  ;;  %v300_v41 = vadd.f32 %v298_v32, %v271_v37  ;;  %v329_v42 = vpop.permute.xlu1 %328 }
  0x8d   : > { %v349_v43 = vmul.f32 %v344_v33, %v329_v42  ;;  %v350_v44 = vmul.f32 %v348_v34, %v329_v42 }
  0x8e   : > { %v325_v47 = vadd.f32 %v323_v38, %v299_v40  ;;  %v326_v48 = vadd.f32 %v324_v39, %v300_v41 }
  0x90   : > { %v351_v49 = vadd.f32 %v349_v43, %v325_v47  ;;  %v352_v50 = vadd.f32 %v350_v44, %v326_v48  ;;  %v355_v51 = vpop.permute.xlu0 %354 }
  0x91   : > { %v375_v52 = vmul.f32 %v370_v45, %v355_v51  ;;  %v376_v53 = vmul.f32 %v374_v46, %v355_v51  ;;  %v390_v54 = vpop.permute.xlu1 %389 }
  0x93   : > { %v377_v55 = vadd.f32 %v375_v52, %v351_v49  ;;  %v378_v56 = vadd.f32 %v376_v53, %v352_v50 }
  0x95   : > { %v379_v57 = vmax.f32 %v377_v55, 0.0  ;;  %v380_v58 = vmax.f32 %v378_v56, 0.0  ;;  %v385_v59 = vpop.permute.xlu1 %384  ;;  %v406_v0 = vpop.permute.xlu0 %405 }
  0x97   : > { %v395_v60 = vrot.slane %v379_v57, %v281_v10  ;;  %v399_v61 = vrot.slane %v380_v58, %v281_v10  ;;  %v411_v62 = vrot.slane %v379_v57, %v307_v13  ;;  %v415_v63 = vrot.slane %v380_v58, %v307_v13 }
  0x98   : > { %v427_v4 = vrot.slane %v379_v57, %v333_v17  ;;  %v431_v5 = vrot.slane %v380_v58, %v333_v17  ;;  %v443_v18 = vrot.slane %v379_v57, %v359_v25  ;;  %v447_v19 = vrot.slane %v380_v58, %v359_v25 }
  0x99   : > { %v400_v1 = vmul.f32 %v395_v60, %v390_v54  ;;  %v401_v2 = vmul.f32 %v399_v61, %v390_v54  ;;  %v416_v8 = vmul.f32 %v411_v62, %v406_v0  ;;  %v417_v9 = vmul.f32 %v415_v63, %v406_v0 }
  0x9a   : > { %v422_v3 = vpop.permute.xlu1 %421  ;;  %v454_v17 = vcombine.high %v701_v12, %v701_v12 }
  0x9b   : > { %v402_v6 = vadd.f32 %v400_v1, %v385_v59  ;;  %v403_v7 = vadd.f32 %v401_v2, %v385_v59  ;;  %v432_v15 = vmul.f32 %v427_v4, %v422_v3  ;;  %v433_v16 = vmul.f32 %v431_v5, %v422_v3 }
  0x9d   : > { %v418_v11 = vadd.f32 %v416_v8, %v402_v6  ;;  %v419_v14 = vadd.f32 %v417_v9, %v403_v7 }
  0x9f   : > { %v434_v10 = vadd.f32 %v432_v15, %v418_v11  ;;  %v435_v20 = vadd.f32 %v433_v16, %v419_v14  ;;  %v438_v13 = vpop.permute.xlu1 %437 }
  0xa0   : > { %v448_v21 = vmul.f32 %v443_v18, %v438_v13  ;;  %v449_v22 = vmul.f32 %v447_v19, %v438_v13 }
  0xa2   : > { %v450_v23 = vadd.f32 %v448_v21, %v434_v10  ;;  %v451_v24 = vadd.f32 %v449_v22, %v435_v20 }
  0xa4   : > { %v452_v26 = vmax.f32 %v450_v23, 0.0  ;;  %v453_v27 = vmax.f32 %v451_v24, 0.0 }
  0xa6   : > { %v456_v28 = vadd.f32 %v452_v26, %v701_v12  ;;  %v457_v29 = vadd.f32 %v454_v17, %v453_v27 }
  0xa8   : > { %v460_v25 = vcombine.low %v456_v28, %v457_v29 }
  0xaa   : > { %462 = vst [vmem:[%s262_s11] sm:$0xff] %v460_v25 }
  0xab PF: > { %s15_s20 = sadd.s32 1, %s623_s20   ;;  %s734_s18 = smov %s619_s19 }
  0xac   : > { %p12_p5 = scmp.ge.s32.totalorder %s15_s20, 4   ;;  %s735_s19 = smov %s737_s21 }
  0xae   :  { %14 = sbr.rel (!%p12_p5) target bundleno = 2 (0x2), region = 70 }

</bundles_post_ra>
